<compile_context>
chip_gen: v7x
topology: tpu7x:2x2x1
jax: 0.10.0
libtpu: 0.0.40
codegen_flags: <defaults>
</compile_context>

<pallas_src>
import functools

import jax
import jax.numpy as jnp
from jax.experimental import pallas as pl
from jax.experimental.pallas import tpu as pltpu

HP = 128  # padded hidden / head width (one full vreg lane width)


def _policy_kernel(x_ref, w1_ref, w2_ref, wh_ref, b_ref, out_ref):
    x = x_ref[...]
    b = b_ref[...]                      # [3, HP]: rows = b1_pad, b2_pad, bhead_pad
    h1 = jnp.maximum(
        jnp.dot(x, w1_ref[...], preferred_element_type=jnp.float32) + b[0:1, :], 0.0)
    h2 = jnp.maximum(
        jnp.dot(h1, w2_ref[...], preferred_element_type=jnp.float32) + b[1:2, :], 0.0)
    out_ref[...] = (
        jnp.dot(h2, wh_ref[...], preferred_element_type=jnp.float32) + b[2:3, :]
    ).astype(out_ref.dtype)


def pack_params(params, state_dim, action_dim, hidden_dims=(64, 64)):
    """One-time host-side prep: pad hidden width to 128, fuse the two heads into
    one lane-dense [128, 128] weight, and pack the three biases into one array."""
    w1, b1, w2, b2, wa, ba, wv, bv = params
    h1d, h2d = hidden_dims

    w1p = jnp.zeros((state_dim, HP), jnp.float32).at[:, :h1d].set(w1)
    w2p = jnp.zeros((HP, HP), jnp.float32).at[:h1d, :h2d].set(w2)
    whp = (jnp.zeros((HP, HP), jnp.float32)
           .at[:h2d, :action_dim].set(wa)
           .at[:h2d, action_dim:action_dim + 1].set(wv))
    bp = (jnp.zeros((3, HP), jnp.float32)
          .at[0, :h1d].set(b1[0])
          .at[1, :h2d].set(b2[0])
          .at[2, :action_dim].set(ba[0])
          .at[2, action_dim].set(bv[0, 0]))
    return w1p, w2p, whp, bp


@functools.partial(jax.jit, static_argnames=("action_dim", "block_b"))
def discrete_policy_forward(x, packed_params, action_dim, block_b=512):
    """Fused forward. x: [B, state_dim] f32. Returns (logits [B, A], values [B, 1])."""
    w1p, w2p, whp, bp = packed_params
    B, state_dim = x.shape

    if B >= 2 * block_b and B % block_b == 0:
        # Large-batch path: 1-D parallel grid over batch (amortizes per-step
        # overhead; shards across both TensorCores on v7x).
        out = pl.pallas_call(
            _policy_kernel,
            out_shape=jax.ShapeDtypeStruct((B, HP), jnp.float32),
            grid=(B // block_b,),
            in_specs=[
                pl.BlockSpec((block_b, state_dim), lambda i: (i, 0)),
                pl.BlockSpec(w1p.shape, lambda i: (0, 0)),
                pl.BlockSpec(w2p.shape, lambda i: (0, 0)),
                pl.BlockSpec(whp.shape, lambda i: (0, 0)),
                pl.BlockSpec(bp.shape, lambda i: (0, 0)),
            ],
            out_specs=pl.BlockSpec((block_b, HP), lambda i: (i, 0)),
            compiler_params=pltpu.CompilerParams(
                dimension_semantics=("parallel",)),
        )(x, w1p, w2p, whp, bp)
    else:
        # Small-batch path: everything fits in VMEM as full-array blocks.
        vmem = pl.BlockSpec(memory_space=pltpu.VMEM)
        out = pl.pallas_call(
            _policy_kernel,
            out_shape=jax.ShapeDtypeStruct((B, HP), jnp.float32),
            in_specs=[vmem] * 5,
            out_specs=vmem,
        )(x, w1p, w2p, whp, bp)

    logits = out[:, :action_dim]
    values = out[:, action_dim:action_dim + 1]
    return logits, values


def init_params(key, state_dim, action_dim, hidden_dims=(64, 64)):
    """PyTorch-style (uniform +/- 1/sqrt(fan_in)) init.
    Weights are stored as [in, out] (transposed vs. nn.Linear storage)."""
    dims = [state_dim] + list(hidden_dims)
    params = []
    keys = jax.random.split(key, 2 * (len(dims) - 1) + 4)
    ki = 0

    def make_linear(fan_in, fan_out):
        nonlocal ki
        bound = 1.0 / jnp.sqrt(jnp.float32(fan_in))
        w = jax.random.uniform(keys[ki], (fan_in, fan_out), jnp.float32, -bound, bound)
        b = jax.random.uniform(keys[ki + 1], (1, fan_out), jnp.float32, -bound, bound)
        ki += 2
        return w, b

    for i in range(len(dims) - 1):
        w, b = make_linear(dims[i], dims[i + 1])
        params.extend([w, b])
    wa, ba = make_linear(hidden_dims[-1], action_dim)   # action head
    wv, bv = make_linear(hidden_dims[-1], 1)            # value head
    params.extend([wa, ba, wv, bv])
    return tuple(params)


def reference_forward(x, params):
    w1, b1, w2, b2, wa, ba, wv, bv = params
    h1 = jnp.maximum(x @ w1 + b1, 0.0)
    h2 = jnp.maximum(h1 @ w2 + b2, 0.0)
    return h2 @ wa + ba, h2 @ wv + bv


# TODO(synk): get_action's Categorical sampling / .item() extraction is host-side
# control flow in the PyTorch module; the JAX caller should sample from the logits.

if __name__ == "__main__":
    batch, state_dim, action_dim = 8, 16, 6
    hidden_dims = (64, 64)

    key = jax.random.PRNGKey(0)
    k_x, k_p = jax.random.split(key)
    x = jax.random.normal(k_x, (batch, state_dim), dtype=jnp.float32)
    params = init_params(k_p, state_dim, action_dim, hidden_dims)
    packed = pack_params(params, state_dim, action_dim, hidden_dims)

    logits, values = discrete_policy_forward(x, packed, action_dim)
    logits = jax.block_until_ready(logits)
    values = jax.block_until_ready(values)

    ref_logits, ref_values = reference_forward(x, params)
    assert logits.shape == (batch, action_dim)
    assert values.shape == (batch, 1)
    assert jnp.allclose(logits, ref_logits, atol=1e-5, rtol=1e-5)
    assert jnp.allclose(values, ref_values, atol=1e-5, rtol=1e-5)

    print("KERNEL_OK")
</pallas_src>

<mosaic_0001>
module attributes {stable_mosaic.version = 11 : i64} {
  func.func @_policy_kernel(%arg0: memref<8x16xf32, #tpu.memory_space<vmem>>, %arg1: memref<16x128xf32, #tpu.memory_space<vmem>>, %arg2: memref<128x128xf32, #tpu.memory_space<vmem>>, %arg3: memref<128x128xf32, #tpu.memory_space<vmem>>, %arg4: memref<3x128xf32, #tpu.memory_space<vmem>>, %arg5: memref<8x128xf32, #tpu.memory_space<vmem>>) attributes {dimension_semantics = [], scalar_prefetch = 0 : i64, scratch_operands = 0 : i64, tpu.core_type = #tpu.core_type<tc>} {
    %c0 = arith.constant 0 : index
    %c0_0 = arith.constant 0 : index
    %0 = vector.load %arg0[%c0, %c0_0] : memref<8x16xf32, #tpu.memory_space<vmem>>, vector<8x16xf32>
    %c0_1 = arith.constant 0 : index
    %c0_2 = arith.constant 0 : index
    %1 = vector.load %arg4[%c0_1, %c0_2] : memref<3x128xf32, #tpu.memory_space<vmem>>, vector<3x128xf32>
    %c0_3 = arith.constant 0 : index
    %c0_4 = arith.constant 0 : index
    %2 = vector.load %arg1[%c0_3, %c0_4] : memref<16x128xf32, #tpu.memory_space<vmem>>, vector<16x128xf32>
    %cst = arith.constant dense<0.000000e+00> : vector<8x128xf32>
    %3 = tpu.matmul %0, %2, %cst {dimension_numbers = #tpu.dot_dimension_numbers<[1], [0], [0], [1], [0, 0, 1, 1], [], []>} : vector<8x16xf32>, vector<16x128xf32>, vector<8x128xf32> -> vector<8x128xf32>
    %4 = vector.extract_strided_slice %1 {offsets = [0, 0], sizes = [1, 128], strides = [1, 1]} : vector<3x128xf32> to vector<1x128xf32>
    %5 = vector.broadcast %4 : vector<1x128xf32> to vector<8x128xf32>
    %6 = arith.addf %3, %5 : vector<8x128xf32>
    %cst_5 = arith.constant 0.000000e+00 : f32
    %7 = vector.broadcast %cst_5 : f32 to vector<8x128xf32>
    %8 = arith.maximumf %6, %7 : vector<8x128xf32>
    %c0_6 = arith.constant 0 : index
    %c0_7 = arith.constant 0 : index
    %9 = vector.load %arg2[%c0_6, %c0_7] : memref<128x128xf32, #tpu.memory_space<vmem>>, vector<128x128xf32>
    %cst_8 = arith.constant dense<0.000000e+00> : vector<8x128xf32>
    %10 = tpu.matmul %8, %9, %cst_8 {dimension_numbers = #tpu.dot_dimension_numbers<[1], [0], [0], [1], [0, 0, 1, 1], [], []>} : vector<8x128xf32>, vector<128x128xf32>, vector<8x128xf32> -> vector<8x128xf32>
    %11 = vector.extract_strided_slice %1 {offsets = [1, 0], sizes = [1, 128], strides = [1, 1]} : vector<3x128xf32> to vector<1x128xf32>
    %12 = vector.broadcast %11 : vector<1x128xf32> to vector<8x128xf32>
    %13 = arith.addf %10, %12 : vector<8x128xf32>
    %cst_9 = arith.constant 0.000000e+00 : f32
    %14 = vector.broadcast %cst_9 : f32 to vector<8x128xf32>
    %15 = arith.maximumf %13, %14 : vector<8x128xf32>
    %c0_10 = arith.constant 0 : index
    %c0_11 = arith.constant 0 : index
    %16 = vector.load %arg3[%c0_10, %c0_11] : memref<128x128xf32, #tpu.memory_space<vmem>>, vector<128x128xf32>
    %cst_12 = arith.constant dense<0.000000e+00> : vector<8x128xf32>
    %17 = tpu.matmul %15, %16, %cst_12 {dimension_numbers = #tpu.dot_dimension_numbers<[1], [0], [0], [1], [0, 0, 1, 1], [], []>} : vector<8x128xf32>, vector<128x128xf32>, vector<8x128xf32> -> vector<8x128xf32>
    %18 = vector.extract_strided_slice %1 {offsets = [2, 0], sizes = [1, 128], strides = [1, 1]} : vector<3x128xf32> to vector<1x128xf32>
    %19 = vector.broadcast %18 : vector<1x128xf32> to vector<8x128xf32>
    %20 = arith.addf %17, %19 : vector<8x128xf32>
    %c0_13 = arith.constant 0 : index
    %c0_14 = arith.constant 0 : index
    %21 = vector.load %arg5[%c0_13, %c0_14] : memref<8x128xf32, #tpu.memory_space<vmem>>, vector<8x128xf32>
    tpu.vector_store %arg5[%c0_13, %c0_14], %20 {strides = array<i32>} : memref<8x128xf32, #tpu.memory_space<vmem>>, vector<8x128xf32>,
    return
  }
}

</mosaic_0001>

<bundles_post_ra>
// kernel: discrete_policy_forward.1
= control target key start
LH: loop header
LB: loop body
LE: loop exit
PB: predicated region body
PF: predicated region fallthrough
CT: control target
= control target key end

     0   :  { %10 = vsyncpa [#allocation3], 0  ;;  %s736_s0 = inlined_call_operand.hbm [shape: f32[8,16], index: 0, kind: input, shape index: {}]   ;;  %s737_s1 = inlined_call_operand.hbm [shape: f32[16,128], index: 1, kind: input, shape index: {}]   ;;  %s738_s2 = inlined_call_operand.hbm [shape: f32[128,128], index: 2, kind: input, shape index: {}]   ;;  %s739_s3 = inlined_call_operand.hbm [shape: f32[128,128], index: 3, kind: input, shape index: {}]   ;;  %s740_s4 = inlined_call_operand.vmem [shape: f32[3,128], index: 4, kind: input, shape index: {}]   ;;  %s741_s5 = inlined_call_operand.vmem [shape: f32[8,128], index: 5, kind: output, shape index: {}]  }
   0x1   :  { %11 = vsyncpa [#allocation5], 0 }
   0x2   :  { %12 = vsyncpa [#allocation8], 0  ;;  %s614_s18 = smov [#allocation4]   ;;  %s520_s22 = scalar_lea.hbm %s737_s1, 256 }
   0x3   :  { %s28_s19 = sshll.u32 %s614_s18, 4  ;;  %p521_p0 = scmp.ne.s32.totalorder %s737_s1, %s520_s22  ;;  %s29_s19 = int_to_ptr.vmem [resolvable:$true] %s28_s19 }
   0x4   :  { %p524_p1 = scmp.lt.u32.totalorder %s520_s22, %s737_s1 }
   0x6   :  { %p526_p2 = pnand %p524_p1, %p521_p0 }
   0x8   :  { %529 = shalt.err (!%p526_p2)
}
   0x9   :  { %s530_s27 = scalar_lea.vmem %s29_s19, 256  ;;  %p535_p4 = scmp.lt.s32.totalorder %s29_s19, %s29_s19 }
   0xa   :  { %p531_p3 = scmp.ne.s32.totalorder %s29_s19, %s530_s27  ;;  %p536_p5 = scmp.lt.s32.totalorder %s530_s27, %s530_s27 }
   0xc   :  { %p537_p6 = por %p536_p5, %p535_p4 }
   0xe   :  { %p538_p7 = pnand %p537_p6, %p531_p3 }
  0x10   :  { %541 = shalt.err (!%p538_p7)
}
  0x11   :  { %s615_s28 = smov 128   ;;  %s616_s29 = smov 8  }
  0x12   :  { %34 = dma.hbm_to_vmem [thread:$0]  %s737_s1, 256, %s29_s19, [#allocation5], %s615_s28, %s615_s28, %s616_s29  }
  0x13   :  { %s617_s7 = smov [#allocation2]   ;;  %s618_s9 = smov [#allocation6]  }
  0x14   :  { %s19_s8 = sshll.u32 %s617_s7, 4  ;;  %s40_s10 = sshll.u32 %s618_s9, 4  ;;  %s20_s8 = int_to_ptr.vmem [resolvable:$true] %s19_s8  ;;  %s41_s10 = int_to_ptr.vmem [resolvable:$true] %s40_s10 }
  0x15   :  { %s542_s13 = scalar_lea.hbm %s736_s0, 128 }
  0x16   :  { %p543_p8 = scmp.ne.s32.totalorder %s736_s0, %s542_s13  ;;  %p546_p9 = scmp.lt.u32.totalorder %s542_s13, %s736_s0 }
  0x18   :  { %p548_p10 = pnand %p546_p9, %p543_p8 }
  0x1a   :  { %551 = shalt.err (!%p548_p10)
}
  0x1b   :  { %s552_s1 = scalar_lea.vmem %s20_s8, 128  ;;  %p557_p12 = scmp.lt.s32.totalorder %s20_s8, %s20_s8 }
  0x1c   :  { %p553_p11 = scmp.ne.s32.totalorder %s20_s8, %s552_s1  ;;  %p558_p13 = scmp.lt.s32.totalorder %s552_s1, %s552_s1 }
  0x1e   :  { %p559_p0 = por %p558_p13, %p557_p12 }
  0x20   :  { %p560_p1 = pnand %p559_p0, %p553_p11 }
  0x22   :  { %563 = shalt.err (!%p560_p1)
}
  0x23   :  { %22 = dma.hbm_to_vmem [thread:$0]  %s736_s0, 128, %s20_s8, [#allocation3]  }
  0x24   :  { %s564_s22 = scalar_lea.hbm %s738_s2, 2048 }
  0x25   :  { %p565_p2 = scmp.ne.s32.totalorder %s738_s2, %s564_s22  ;;  %p568_p3 = scmp.lt.u32.totalorder %s564_s22, %s738_s2 }
  0x27   :  { %p570_p4 = pnand %p568_p3, %p565_p2 }
  0x29   :  { %573 = shalt.err (!%p570_p4)
}
  0x2a   :  { %s574_s27 = scalar_lea.vmem %s41_s10, 2048  ;;  %p579_p6 = scmp.lt.s32.totalorder %s41_s10, %s41_s10 }
  0x2b   :  { %p575_p5 = scmp.ne.s32.totalorder %s41_s10, %s574_s27  ;;  %p580_p7 = scmp.lt.s32.totalorder %s574_s27, %s574_s27 }
  0x2d   :  { %p581_p8 = por %p580_p7, %p579_p6 }
  0x2f   :  { %p582_p9 = pnand %p581_p8, %p575_p5 }
  0x31   :  { %585 = shalt.err (!%p582_p9)
}
  0x32   :  { %46 = dma.hbm_to_vmem [thread:$0]  %s738_s2, 2048, %s41_s10, [#allocation5], %s615_s28, %s615_s28, %s616_s29  }
  0x33   :  { %s619_s6 = smov [#allocation7]   ;;  %s586_s11 = scalar_lea.hbm %s739_s3, 2048 }
  0x34   :  { %s52_s7 = sshll.u32 %s619_s6, 4  ;;  %p587_p10 = scmp.ne.s32.totalorder %s739_s3, %s586_s11  ;;  %s53_s7 = int_to_ptr.vmem [resolvable:$true] %s52_s7 }
  0x35   :  { %p590_p11 = scmp.lt.u32.totalorder %s586_s11, %s739_s3 }
  0x37   :  { %p592_p12 = pnand %p590_p11, %p587_p10 }
  0x39   :  { %595 = shalt.err (!%p592_p12)
}
  0x3a   :  { %s596_s16 = scalar_lea.vmem %s53_s7, 2048  ;;  %p601_p0 = scmp.lt.s32.totalorder %s53_s7, %s53_s7 }
  0x3b   :  { %p597_p13 = scmp.ne.s32.totalorder %s53_s7, %s596_s16  ;;  %p602_p1 = scmp.lt.s32.totalorder %s596_s16, %s596_s16 }
  0x3d   :  { %p603_p2 = por %p602_p1, %p601_p0 }
  0x3f   :  { %p604_p3 = pnand %p603_p2, %p597_p13 }
  0x41   :  { %607 = shalt.err (!%p604_p3)
}
  0x42   :  { %58 = dma.hbm_to_vmem [thread:$0]  %s739_s3, 2048, %s53_s7, [#allocation8], %s615_s28, %s615_s28, %s616_s29  }
  0x43   :  { %608 = dma.done.wait [#allocation3], 128  }
  0x44   :  { %609 = vsyncadd [#allocation3], 4294967168 }
  0x45   :  { %610 = dma.done.wait [#allocation5], 2304  }
  0x46   :  { %611 = vsyncadd [#allocation5], 4294964992 }
  0x47   :  { %612 = dma.done.wait [#allocation8], 2048  }
  0x48   :  { %613 = vsyncadd [#allocation8], 4294965248  ;;  %v620_v0 = vmov 0.0|0.0   ;;  %vm621_vm0 = vmmov 0   ;;  %v622_v1 = vmov 0.0   ;;  %v75_v2 = vld [vmem:[#allocation4] sm:$0xff]  ;;  %v77_v51 = vlaneseq }
  0x49   :  { %460 = vmatprep.subr.bf16.mxu0 %v620_v0  ;;  %387 = vmatprep.mubr.msk.f32.mxu0 %vm621_vm0, %v622_v1  ;;  %v76_v3 = vld [vmem:[#allocation4 + $0x8] sm:$0xff]  ;;  %v156_v5 = vld [vmem:[#allocation6] sm:$0xff]  ;;  %v157_v6 = vld [vmem:[#allocation6 + $0x8] sm:$0xff]  ;;  %vm81_vm1 = vcmask 130048  }
  0x4a   :  { %463 = vmatprep.subr.bf16.mxu1 %v620_v0  ;;  %422 = vmatprep.mubr.msk.f32.mxu1 %vm621_vm0, %v622_v1  ;;  %v461_v4 = vpack.c.bf16 %v76_v3, %v75_v2  ;;  %v158_v7 = vld [vmem:[#allocation6 + $0x10] sm:$0xff]  ;;  %v464_v8 = vpack.c.bf16 %v157_v6, %v156_v5  ;;  %v159_v9 = vld [vmem:[#allocation6 + $0x18] sm:$0xff]  ;;  %v73_v10 = vld [vmem:[#allocation2] sm:$0xff]  ;;  %v78_v52 = vshrl.u32 %v77_v51, 7 }
  0x4b   :  { %v467_v11 = vpack.c.bf16 %v159_v9, %v158_v7  ;;  %v160_v12 = vld [vmem:[#allocation6 + $0x20] sm:$0xff]  ;;  %v161_v13 = vld [vmem:[#allocation6 + $0x28] sm:$0xff]  ;;  %v162_v15 = vld [vmem:[#allocation6 + $0x30] sm:$0xff] }
  0x4c   :  { %462 = vmatpush3.bf16.msra.mxu0 %v461_v4  ;;  %465 = vmatpush3.bf16.msra.mxu1 %v464_v8  ;;  %v470_v14 = vpack.c.bf16 %v161_v13, %v160_v12  ;;  %v163_v16 = vld [vmem:[#allocation6 + $0x38] sm:$0xff]  ;;  %v164_v18 = vld [vmem:[#allocation6 + $0x40] sm:$0xff]  ;;  %v165_v19 = vld [vmem:[#allocation6 + $0x48] sm:$0xff]  ;;  %v79_v53 = vsub.s32 0, %v78_v52  ;;  %v174_v63 = vsub.s32 1, %v78_v52  ;;  %v265_v5 = vsub.s32 2, %v78_v52 }
  0x4d   :  { %487 = vmatprep.subr.bf16.mxu0 %v620_v0  ;;  %466 = vmatprep.subr.bf16.mxu1 %v620_v0  ;;  %v473_v17 = vpack.c.bf16 %v163_v16, %v162_v15  ;;  %v476_v20 = vpack.c.bf16 %v165_v19, %v164_v18  ;;  %v166_v21 = vld [vmem:[#allocation6 + $0x50] sm:$0xff]  ;;  %v167_v22 = vld [vmem:[#allocation6 + $0x58] sm:$0xff]  ;;  %v168_v24 = vld [vmem:[#allocation6 + $0x60] sm:$0xff] }
  0x4e   :  { %v479_v23 = vpack.c.bf16 %v167_v22, %v166_v21  ;;  %v169_v25 = vld [vmem:[#allocation6 + $0x68] sm:$0xff]  ;;  %v170_v27 = vld [vmem:[#allocation6 + $0x70] sm:$0xff]  ;;  %v171_v28 = vld [vmem:[#allocation6 + $0x78] sm:$0xff] }
  0x4f   :  { %388 = vmatmul.mubr.msk.f32.vlgmr.msra.gmra.mrb[0].mxu0 %vm81_vm1, %v73_v10  ;;  %v482_v26 = vpack.c.bf16 %v169_v25, %v168_v24  ;;  %v485_v29 = vpack.c.bf16 %v171_v28, %v170_v27  ;;  %v247_v30 = vld [vmem:[#allocation7] sm:$0xff]  ;;  %v248_v31 = vld [vmem:[#allocation7 + $0x8] sm:$0xff]  ;;  %v249_v32 = vld [vmem:[#allocation7 + $0x10] sm:$0xff] }
  0x50   :  { %457 = vmatprep.mubr.msk.f32.mxu0 %vm621_vm0, %v622_v1  ;;  %468 = vmatpush3.bf16.msra.mxu1 %v467_v11  ;;  %v488_v33 = vpack.c.bf16 %v248_v31, %v247_v30  ;;  %v250_v34 = vld [vmem:[#allocation7 + $0x18] sm:$0xff]  ;;  %v251_v36 = vld [vmem:[#allocation7 + $0x20] sm:$0xff]  ;;  %v252_v37 = vld [vmem:[#allocation7 + $0x28] sm:$0xff] }
  0x51   :  { %469 = vmatprep.subr.bf16.mxu1 %v620_v0  ;;  %v491_v35 = vpack.c.bf16 %v250_v34, %v249_v32  ;;  %v494_v38 = vpack.c.bf16 %v252_v37, %v251_v36  ;;  %v253_v39 = vld [vmem:[#allocation7 + $0x30] sm:$0xff]  ;;  %v254_v40 = vld [vmem:[#allocation7 + $0x38] sm:$0xff]  ;;  %v255_v42 = vld [vmem:[#allocation7 + $0x40] sm:$0xff] }
  0x52   :  { %489 = vmatpush3.bf16.msra.mxu0 %v488_v33  ;;  %v497_v41 = vpack.c.bf16 %v254_v40, %v253_v39  ;;  %v256_v43 = vld [vmem:[#allocation7 + $0x48] sm:$0xff]  ;;  %v257_v45 = vld [vmem:[#allocation7 + $0x50] sm:$0xff]  ;;  %v258_v46 = vld [vmem:[#allocation7 + $0x58] sm:$0xff] }
  0x53   :  { %490 = vmatprep.subr.bf16.mxu0 %v620_v0  ;;  %v500_v44 = vpack.c.bf16 %v256_v43, %v255_v42  ;;  %v503_v47 = vpack.c.bf16 %v258_v46, %v257_v45  ;;  %v259_v48 = vld [vmem:[#allocation7 + $0x60] sm:$0xff]  ;;  %v260_v49 = vld [vmem:[#allocation7 + $0x68] sm:$0xff]  ;;  %v261_v60 = vld [vmem:[#allocation7 + $0x70] sm:$0xff] }
  0x54   :  { %471 = vmatpush3.bf16.msra.mxu1 %v470_v14  ;;  %v506_v50 = vpack.c.bf16 %v260_v49, %v259_v48  ;;  %v74_v54 = vld [vmem:[%s740_s4] sm:$0x7]  ;;  %v262_v61 = vld [vmem:[#allocation7 + $0x78] sm:$0xff] }
  0x55   :  { %472 = vmatprep.subr.bf16.mxu1 %v620_v0  ;;  %v80_v55 = vrot.slane %v74_v54, %v79_v53  ;;  %v509_v62 = vpack.c.bf16 %v262_v61, %v261_v60  ;;  %v175_v1 = vrot.slane %v74_v54, %v174_v63  ;;  %v266_v6 = vrot.slane %v74_v54, %v265_v5 }
  0x56   :  { %492 = vmatpush3.bf16.msra.mxu0 %v491_v35 }
  0x57   :  { %493 = vmatprep.subr.bf16.mxu0 %v620_v0 }
  0x58   :  { %474 = vmatpush3.bf16.msra.mxu1 %v473_v17 }
  0x59   :  { %475 = vmatprep.subr.bf16.mxu1 %v620_v0 }
  0x5a   :  { %495 = vmatpush3.bf16.msra.mxu0 %v494_v38 }
  0x5b   :  { %496 = vmatprep.subr.bf16.mxu0 %v620_v0 }
  0x5c   :  { %477 = vmatpush3.bf16.msra.mxu1 %v476_v20 }
  0x5d   :  { %478 = vmatprep.subr.bf16.mxu1 %v620_v0 }
  0x5e   :  { %498 = vmatpush3.bf16.msra.mxu0 %v497_v41 }
  0x5f   :  { %499 = vmatprep.subr.bf16.mxu0 %v620_v0 }
  0x60   :  { %480 = vmatpush3.bf16.msra.mxu1 %v479_v23 }
  0x61   :  { %481 = vmatprep.subr.bf16.mxu1 %v620_v0 }
  0x62   :  { %501 = vmatpush3.bf16.msra.mxu0 %v500_v44 }
  0x63   :  { %502 = vmatprep.subr.bf16.mxu0 %v620_v0 }
  0x64   :  { %483 = vmatpush3.bf16.msra.mxu1 %v482_v26 }
  0x65   :  { %484 = vmatprep.subr.bf16.mxu1 %v620_v0 }
  0x66   :  { %504 = vmatpush3.bf16.msra.mxu0 %v503_v47 }
  0x67   :  { %505 = vmatprep.subr.bf16.mxu0 %v620_v0 }
  0x68   :  { %486 = vmatpush3.bf16.msra.mxu1 %v485_v29 }
  0x6a   :  { %507 = vmatpush3.bf16.msra.mxu0 %v506_v50 }
  0x6b   :  { %508 = vmatprep.subr.bf16.mxu0 %v620_v0 }
  0x6e   :  { %510 = vmatpush3.bf16.msra.mxu0 %v509_v62 }
 0x122   :  { %v151_v56 = vpop.f32.mrb[0].mxu0 }
 0x123   :  { %v152_v57 = vadd.f32 %v151_v56, %v80_v55  ;;  %v389_v58 = vpop.f32.mrb[1].mxu0 }
 0x125   :  { %v155_v59 = vmax.f32 %v152_v57, 0.0 }
 0x127   :  { %423 = vmatmul.mubr.f32.vlgmr.msra.gmra.mrb[0].mxu1 %v155_v59 }
 0x1fa   :  { %v242_v0 = vpop.f32.mrb[0].mxu1 }
 0x1fb   :  { %v243_v2 = vadd.f32 %v242_v0, %v175_v1  ;;  %v424_v3 = vpop.f32.mrb[1].mxu1 }
 0x1fd   :  { %v246_v4 = vmax.f32 %v243_v2, 0.0 }
 0x1ff   :  { %458 = vmatmul.mubr.f32.vlgmr.msra.gmra.mrb[2].mxu0 %v246_v4 }
 0x2d2   :  { %v333_v7 = vpop.f32.mrb[2].mxu0 }
 0x2d3   :  { %v334_v8 = vadd.f32 %v333_v7, %v266_v6  ;;  %v459_v9 = vpop.f32.mrb[3].mxu0 }
 0x2d5   :  { %337 = vst [vmem:[%s741_s5] sm:$0xff] %v334_v8 }
 0x2d6   :  { %342 = vsyncpa [#allocation3], 1 }
 0x2d7   :  { %343 = vsyncpa [#allocation5], 1 }
 0x2d8   :  { %344 = vsyncpa [#allocation8], 1 }

</bundles_post_ra>
